<compile_context>
chip_gen: v7x
topology: tpu7x:2x2x1
jax: 0.10.0
libtpu: 0.0.40
codegen_flags: <defaults>
</compile_context>

<pallas_src>
import jax
import jax.numpy as jnp
from jax.experimental import pallas as pl
from jax.experimental.pallas import tpu as pltpu


def _mlp_kernel(p_ref, x_ref, o_ref):
    # p_ref : SMEM f32[9] = [W1_00, W1_01, W1_10, W1_11, b1_0, b1_1,
    #                        W2_00, W2_01, b2_0]           (PyTorch (out, in))
    # x_ref : VMEM (2, BT)  -- features on sublanes, batch on lanes
    # o_ref : VMEM (1, BT)  -- lane-dense output
    x0 = x_ref[0:1, :]                                   # (1, BT)
    x1 = x_ref[1:2, :]                                   # (1, BT)

    # fc1 + sigmoid, unrolled on the VPU with scalar (SMEM) weights.
    h0 = jax.nn.sigmoid(x0 * p_ref[0] + x1 * p_ref[1] + p_ref[4])
    h1 = jax.nn.sigmoid(x0 * p_ref[2] + x1 * p_ref[3] + p_ref[5])

    # fc2 + sigmoid.
    y = jax.nn.sigmoid(h0 * p_ref[6] + h1 * p_ref[7] + p_ref[8])

    o_ref[...] = y.astype(o_ref.dtype)


def three_point_six_forward(x, w1, b1, w2, b2, *, max_block_b=2048):
    """x: (B, 2) f32.  w1: (2,2) PyTorch layout (out,in).  b1: (2,).
       w2: (1,2) PyTorch layout.  b2: (1,).  Returns (B, 1) f32."""
    B = x.shape[0]

    # Pack all 9 parameters into one small f32 vector that lives in SMEM.
    params = jnp.concatenate(
        [w1.reshape(-1), b1.reshape(-1), w2.reshape(-1), b2.reshape(-1)]
    ).astype(jnp.float32)                                 # f32[9]

    # Lane-dense layout: batch on the lane axis, padded to a multiple of 128.
    bt = min(max_block_b, pl.cdiv(B, 128) * 128)          # lane tile
    b_pad = pl.cdiv(B, bt) * bt
    x_t = jnp.pad(x.astype(jnp.float32), ((0, b_pad - B), (0, 0))).T  # (2, b_pad)

    y_t = pl.pallas_call(
        _mlp_kernel,
        out_shape=jax.ShapeDtypeStruct((1, b_pad), jnp.float32),
        grid=(b_pad // bt,),
        in_specs=[
            pl.BlockSpec(memory_space=pltpu.MemorySpace.SMEM),  # packed params
            pl.BlockSpec((2, bt), lambda i: (0, i)),            # x, batch on lanes
        ],
        out_specs=pl.BlockSpec((1, bt), lambda i: (0, i)),      # lane-dense out
        compiler_params=pltpu.CompilerParams(
            dimension_semantics=("parallel",)),                  # 2x on v7x dual-TC
    )(params, x_t)

    return y_t[0, :B].reshape(B, 1)


def _ref_forward(x, w1, b1, w2, b2):
    h = jax.nn.sigmoid(x @ w1.T + b1)
    return jax.nn.sigmoid(h @ w2.T + b2)


if __name__ == "__main__":
    key = jax.random.PRNGKey(0)
    kx, k1, k2, k3, k4, kx2 = jax.random.split(key, 6)

    # Deterministic parameter init mimicking nn.Linear (uniform +-1/sqrt(fan_in)).
    bound = 1.0 / jnp.sqrt(2.0)
    w1 = jax.random.uniform(k1, (2, 2), jnp.float32, -bound, bound)   # (out, in)
    b1 = jax.random.uniform(k2, (2,), jnp.float32, -bound, bound)
    w2 = jax.random.uniform(k3, (1, 2), jnp.float32, -bound, bound)   # (out, in)
    b2 = jax.random.uniform(k4, (1,), jnp.float32, -bound, bound)

    # Small-batch check.
    B = 8
    x = jax.random.normal(kx, (B, 2), dtype=jnp.float32)
    out = jax.block_until_ready(three_point_six_forward(x, w1, b1, w2, b2))
    ref = _ref_forward(x, w1, b1, w2, b2)
    assert out.shape == (B, 1)
    assert jnp.allclose(out, ref, atol=1e-5, rtol=1e-5), (out, ref)

    # Padding / non-multiple-of-128 batch check.
    B2 = 300
    x2 = jax.random.normal(kx2, (B2, 2), dtype=jnp.float32)
    out2 = jax.block_until_ready(three_point_six_forward(x2, w1, b1, w2, b2))
    ref2 = _ref_forward(x2, w1, b1, w2, b2)
    assert out2.shape == (B2, 1)
    assert jnp.allclose(out2, ref2, atol=1e-5, rtol=1e-5)

    print("KERNEL_OK")
</pallas_src>

<mosaic_0001>
module attributes {stable_mosaic.version = 11 : i64} {
  func.func @_mlp_kernel(%arg0: i32, %arg1: memref<9xf32, #tpu.memory_space<smem>>, %arg2: memref<2x128xf32, #tpu.memory_space<vmem>>, %arg3: memref<1x128xf32, #tpu.memory_space<vmem>>) attributes {dimension_semantics = [#tpu.dimension_semantics<parallel>], iteration_bounds = array<i64: 1>, scalar_prefetch = 0 : i64, scratch_operands = 0 : i64, tpu.core_type = #tpu.core_type<tc>, window_params = [{transform_indices = @transform_0, window_bounds = array<i64: 9>}, {transform_indices = @transform_1, window_bounds = array<i64: 2, 128>}, {transform_indices = @transform_2, window_bounds = array<i64: 1, 128>}]} {
    %c0 = arith.constant 0 : index
    %c0_0 = arith.constant 0 : index
    %0 = vector.load %arg2[%c0, %c0_0] : memref<2x128xf32, #tpu.memory_space<vmem>>, vector<1x128xf32>
    %c1 = arith.constant 1 : index
    %c0_1 = arith.constant 0 : index
    %1 = vector.load %arg2[%c1, %c0_1] : memref<2x128xf32, #tpu.memory_space<vmem>>, vector<1x128xf32>
    %c0_2 = arith.constant 0 : index
    %2 = memref.load %arg1[%c0_2] : memref<9xf32, #tpu.memory_space<smem>>
    %3 = vector.broadcast %2 : f32 to vector<1x128xf32>
    %4 = arith.mulf %0, %3 : vector<1x128xf32>
    %c1_3 = arith.constant 1 : index
    %5 = memref.load %arg1[%c1_3] : memref<9xf32, #tpu.memory_space<smem>>
    %6 = vector.broadcast %5 : f32 to vector<1x128xf32>
    %7 = arith.mulf %1, %6 : vector<1x128xf32>
    %8 = arith.addf %4, %7 : vector<1x128xf32>
    %c4 = arith.constant 4 : index
    %9 = memref.load %arg1[%c4] : memref<9xf32, #tpu.memory_space<smem>>
    %10 = vector.broadcast %9 : f32 to vector<1x128xf32>
    %11 = arith.addf %8, %10 : vector<1x128xf32>
    %12 = arith.negf %11 : vector<1x128xf32>
    %13 = math.exp %12 : vector<1x128xf32>
    %cst = arith.constant 1.000000e+00 : f32
    %14 = vector.broadcast %cst : f32 to vector<1x128xf32>
    %15 = arith.addf %14, %13 : vector<1x128xf32>
    %16 = arith.divf %14, %15 : vector<1x128xf32>
    %c2 = arith.constant 2 : index
    %17 = memref.load %arg1[%c2] : memref<9xf32, #tpu.memory_space<smem>>
    %18 = vector.broadcast %17 : f32 to vector<1x128xf32>
    %19 = arith.mulf %0, %18 : vector<1x128xf32>
    %c3 = arith.constant 3 : index
    %20 = memref.load %arg1[%c3] : memref<9xf32, #tpu.memory_space<smem>>
    %21 = vector.broadcast %20 : f32 to vector<1x128xf32>
    %22 = arith.mulf %1, %21 : vector<1x128xf32>
    %23 = arith.addf %19, %22 : vector<1x128xf32>
    %c5 = arith.constant 5 : index
    %24 = memref.load %arg1[%c5] : memref<9xf32, #tpu.memory_space<smem>>
    %25 = vector.broadcast %24 : f32 to vector<1x128xf32>
    %26 = arith.addf %23, %25 : vector<1x128xf32>
    %27 = arith.negf %26 : vector<1x128xf32>
    %28 = math.exp %27 : vector<1x128xf32>
    %cst_4 = arith.constant 1.000000e+00 : f32
    %29 = vector.broadcast %cst_4 : f32 to vector<1x128xf32>
    %30 = arith.addf %29, %28 : vector<1x128xf32>
    %31 = arith.divf %29, %30 : vector<1x128xf32>
    %c6 = arith.constant 6 : index
    %32 = memref.load %arg1[%c6] : memref<9xf32, #tpu.memory_space<smem>>
    %33 = vector.broadcast %32 : f32 to vector<1x128xf32>
    %34 = arith.mulf %16, %33 : vector<1x128xf32>
    %c7 = arith.constant 7 : index
    %35 = memref.load %arg1[%c7] : memref<9xf32, #tpu.memory_space<smem>>
    %36 = vector.broadcast %35 : f32 to vector<1x128xf32>
    %37 = arith.mulf %31, %36 : vector<1x128xf32>
    %38 = arith.addf %34, %37 : vector<1x128xf32>
    %c8 = arith.constant 8 : index
    %39 = memref.load %arg1[%c8] : memref<9xf32, #tpu.memory_space<smem>>
    %40 = vector.broadcast %39 : f32 to vector<1x128xf32>
    %41 = arith.addf %38, %40 : vector<1x128xf32>
    %42 = arith.negf %41 : vector<1x128xf32>
    %43 = math.exp %42 : vector<1x128xf32>
    %cst_5 = arith.constant 1.000000e+00 : f32
    %44 = vector.broadcast %cst_5 : f32 to vector<1x128xf32>
    %45 = arith.addf %44, %43 : vector<1x128xf32>
    %46 = arith.divf %44, %45 : vector<1x128xf32>
    %c0_6 = arith.constant 0 : index
    %c0_7 = arith.constant 0 : index
    %47 = vector.load %arg3[%c0_6, %c0_7] : memref<1x128xf32, #tpu.memory_space<vmem>>, vector<1x128xf32>
    tpu.vector_store %arg3[%c0_6, %c0_7], %46 {strides = array<i32>} : memref<1x128xf32, #tpu.memory_space<vmem>>, vector<1x128xf32>,
    return
  }
  func.func @transform_0(%arg0: i32) -> i32 {
    %c0_i32 = arith.constant 0 : i32
    %c0_i32_0 = arith.constant 0 : i32
    return %c0_i32 : i32
  }
  func.func @transform_1(%arg0: i32) -> (i32, i32) {
    %c0_i32 = arith.constant 0 : i32
    %c0_i32_0 = arith.constant 0 : i32
    return %c0_i32, %arg0 : i32, i32
  }
  func.func @transform_2(%arg0: i32) -> (i32, i32) {
    %c0_i32 = arith.constant 0 : i32
    %c0_i32_0 = arith.constant 0 : i32
    return %c0_i32, %arg0 : i32, i32
  }
}

</mosaic_0001>

<bundles_post_ra>
// kernel: tpu_custom_call.1
= control target key start
LH: loop header
LB: loop body
LE: loop exit
PB: predicated region body
PF: predicated region fallthrough
CT: control target
= control target key end

     0   :  { %7 = vsyncpa [#allocation4], 0  ;;  %s197_s0 = inlined_call_operand.hbm [shape: f32[9], index: 0, kind: input, shape index: {}]   ;;  %s198_s1 = inlined_call_operand.vmem [shape: f32[2,128], index: 1, kind: input, shape index: {}]   ;;  %s199_s2 = inlined_call_operand.hbm [shape: f32[1,128], index: 2, kind: output, shape index: {}]  }
   0x1   :  { %8 = vsyncpa [#allocation3], 0  ;;  %s114_s11 = scalar_lea.hbm %s197_s0, 16 }
   0x2   :  { %p115_p0 = scmp.ne.s32.totalorder %s197_s0, %s114_s11  ;;  %p118_p1 = scmp.lt.u32.totalorder %s114_s11, %s197_s0 }
   0x4   :  { %p120_p2 = pnand %p118_p1, %p115_p0 }
   0x6   :  { %123 = shalt.err (!%p120_p2)
}
   0x7   :  { %s150_s16 = smov [#allocation2]  }
   0x8   :  { %16 = dma.hbm_to_smem %s197_s0, 16, %s150_s16, [#allocation4]  }
   0x9   :  { %146 = dma.done.wait [#allocation4], 16  }
   0xa   :  { %147 = vsyncadd [#allocation4], 4294967280 }
   0xb   :  { %22 = sfence }
   0xc   :  { %s25_s19 = sld [smem:[#allocation2]]  ;;  %s89_s20 = sld [smem:[#allocation2 + $0x1]]  ;;  %v23_v0 = vld [vmem:[%s198_s1] sm:$0x1]  ;;  %v24_v1 = vld [vmem:[%s198_s1 + $0x1] sm:$0x1] }
   0xd   :  { %s90_s21 = sld [smem:[#allocation2 + $0x4]]  ;;  %s92_s22 = sld [smem:[#allocation2 + $0x2]] }
   0xe   :  { %s93_s23 = sld [smem:[#allocation2 + $0x3]]  ;;  %s94_s24 = sld [smem:[#allocation2 + $0x5]] }
   0xf   :  { %s96_s0 = sld [smem:[#allocation2 + $0x6]]  ;;  %s97_s1 = sld [smem:[#allocation2 + $0x7]] }
  0x10   :  { %s98_s29 = sld [smem:[#allocation2 + $0x8]]  ;;  %s151_s30 = smov [#allocation5]  }
  0x11   :  { %s80_s3 = sshll.u32 %s151_s30, 4  ;;  %s81_s3 = int_to_ptr.vmem [resolvable:$true] %s80_s3 }
  0x12   :  { %v26_v2 = vstv %s25_s19  ;;  %v29_v4 = vstv %s89_s20  ;;  %s124_s4 = scalar_lea.vmem %s81_s3, 16  ;;  %s128_s5 = scalar_lea.vmem %s81_s3, 32 }
  0x13   :  { %v27_v3 = vmul.f32 %v26_v2, %v23_v0  ;;  %v30_v5 = vmul.f32 %v29_v4, %v24_v1  ;;  %v42_v6 = vstv %s92_s22  ;;  %v33_v8 = vstv %s90_s21  ;;  %p125_p3 = scmp.ne.s32.totalorder %s81_s3, %s124_s4  ;;  %p129_p4 = scmp.lt.s32.totalorder %s81_s3, %s81_s3 }
  0x14   :  { %v45_v7 = vstv %s93_s23  ;;  %v43_v9 = vmul.f32 %v42_v6, %v23_v0  ;;  %v49_v12 = vstv %s94_s24  ;;  %p130_p5 = scmp.lt.s32.totalorder %s128_s5, %s124_s4 }
  0x15   :  { %v46_v10 = vmul.f32 %v45_v7, %v24_v1  ;;  %v31_v11 = vadd.f32 %v30_v5, %v27_v3  ;;  %v58_v22 = vstv %s96_s0  ;;  %v61_v23 = vstv %s97_s1 }
  0x16   :  { %v65_v28 = vstv %s98_s29  ;;  %p131_p6 = por %p130_p5, %p129_p4 }
  0x17   :  { %v47_v13 = vadd.f32 %v46_v10, %v43_v9  ;;  %v34_v14 = vadd.f32 %v33_v8, %v31_v11 }
  0x18   :  { %p132_p7 = pnand %p131_p6, %p125_p3 }
  0x19   :  { %v50_v15 = vadd.f32 %v49_v12, %v47_v13  ;;  %v91_v16 = vmul.f32 -1.442695, %v34_v14 }
  0x1b   :  { %v95_v17 = vmul.f32 -1.442695, %v50_v15  ;;  %102 = vpow2.f32 %v91_v16 }
  0x1d   :  { %104 = vpow2.f32 %v95_v17 }
  0x25   :  { %v103_v18 = vpop.eup %102 }
  0x26   :  { %v38_v20 = vadd.f32 1.0, %v103_v18 }
  0x27   :  { %v105_v19 = vpop.eup %104 }
  0x28   :  { %v54_v21 = vadd.f32 1.0, %v105_v19  ;;  %106 = vrcp.f32 %v38_v20 }
  0x2a   :  { %108 = vrcp.f32 %v54_v21 }
  0x32   :  { %v107_v24 = vpop.eup %106 }
  0x33   :  { %v59_v26 = vmul.f32 %v107_v24, %v58_v22 }
  0x34   :  { %v109_v25 = vpop.eup %108 }
  0x35   :  { %v62_v27 = vmul.f32 %v109_v25, %v61_v23 }
  0x37   :  { %v63_v29 = vadd.f32 %v62_v27, %v59_v26 }
  0x39   :  { %v66_v30 = vadd.f32 %v65_v28, %v63_v29 }
  0x3b   :  { %v99_v31 = vmul.f32 -1.442695, %v66_v30 }
  0x3d   :  { %110 = vpow2.f32 %v99_v31 }
  0x47   :  { %v111_v32 = vpop.eup %110 }
  0x48   :  { %v70_v33 = vadd.f32 1.0, %v111_v32 }
  0x4a   :  { %112 = vrcp.f32 %v70_v33 }
  0x54   :  { %v113_v34 = vpop.eup %112 }
  0x55   :  { %73 = vst [vmem:[#allocation5] sm:$0x1] %v113_v34 }
  0x56   :  { %135 = shalt.err (!%p132_p7)
}
  0x57   :  { %s136_s8 = scalar_lea.hbm %s199_s2, 16 }
  0x58   :  { %p137_p8 = scmp.ne.s32.totalorder %s199_s2, %s136_s8  ;;  %p140_p9 = scmp.lt.u32.totalorder %s136_s8, %s199_s2 }
  0x5a   :  { %p142_p10 = pnand %p140_p9, %p137_p8 }
  0x5c   :  { %145 = shalt.err (!%p142_p10)
}
  0x5d   :  { %83 = dma.vmem_to_hbm [thread:$0]  %s81_s3, 16, %s199_s2, [#allocation3]  }
  0x5e   :  { %148 = dma.done.wait [#allocation3], 16  }
  0x5f   :  { %149 = vsyncadd [#allocation3], 4294967280 }
  0x60   :  { %87 = vsyncpa [#allocation3], 1 }
  0x61   :  { %88 = vsyncpa [#allocation4], 1 }

</bundles_post_ra>
